<compile_context>
chip_gen: v6e
topology: v6e:2x2x1
jax: 0.10.0
libtpu: 0.0.40
codegen_flags: <defaults>
</compile_context>

<pallas_src>
import math
import functools

import jax
import jax.numpy as jnp
from jax.experimental import pallas as pl
from jax.experimental.pallas import tpu as pltpu


_NEG_BIG = -1e30                      # finite "minus infinity" for causal masking


def _vmem_limit_bytes():
    # v5e/v6e: 128 MiB physical VMEM per TensorCore; v7x: 64 MiB.  Ask for ~3/4
    # of physical (capped at 100 MiB) so the compiler keeps headroom for its own
    # scratch + double-buffered blocks; conservative 48 MiB fallback.
    try:
        cap = int(pltpu.get_tpu_info().vmem_capacity_bytes)
        if cap > 0:
            return min(cap * 3 // 4, 100 * 1024 * 1024)
    except Exception:
        pass
    return 48 * 1024 * 1024


def _cparams(sems, vmem_limit):
    return pltpu.CompilerParams(dimension_semantics=sems,
                                vmem_limit_bytes=vmem_limit)


def _pick_head_group(n_heads, head_dim):
    # Smallest head-group size g (dividing H) whose packed width g*D is a
    # multiple of 128 lanes; fall back to all heads (width = E, full last dim).
    for g in range(1, n_heads + 1):
        if n_heads % g == 0 and (g * head_dim) % 128 == 0:
            return g
    return n_heads


# ----------------------------- in-kernel helpers -----------------------------

def _erf(x):
    # Abramowitz & Stegun 7.1.26 (max abs err ~1.5e-7); exp rides the EUP slot.
    a1, a2, a3, a4, a5 = 0.254829592, -0.284496736, 1.421413741, -1.453152027, 1.061405429
    p = 0.3275911
    s = jnp.sign(x)
    ax = jnp.abs(x)
    t = 1.0 / (1.0 + p * ax)
    poly = ((((a5 * t + a4) * t + a3) * t + a2) * t + a1) * t
    return s * (1.0 - poly * jnp.exp(-ax * ax))


def _gelu_exact(x):
    # nn.GELU() default in PyTorch is the exact (erf) form.
    return 0.5 * x * (1.0 + _erf(x * (1.0 / math.sqrt(2.0))))


def _layernorm(x, gamma, beta, eps=1e-5):
    # x: (T, E) f32; gamma/beta: (1, E). Biased variance, eps=1e-5 (PyTorch defaults).
    mu = jnp.mean(x, axis=-1, keepdims=True)
    xc = x - mu
    var = jnp.mean(xc * xc, axis=-1, keepdims=True)
    return xc * jax.lax.rsqrt(var + eps) * gamma + beta


# ------------------------- kernel 1: LN1 + fused QKV --------------------------
# grid (B, S//TS): one (TS,E)x(E,3E) bf16 matmul per step; LN computed once.

def qkv_proj_kernel(x_ref, g_ref, b_ref, w_ref, bias_ref, q_ref, k_ref, v_ref,
                    *, n_embd):
    x = x_ref[0]                                          # (TS, E) f32
    h = _layernorm(x, g_ref[...], b_ref[...]).astype(jnp.bfloat16)
    qkv = jnp.dot(h, w_ref[...], preferred_element_type=jnp.float32) + bias_ref[...]
    E = n_embd
    q_ref[0] = qkv[:, 0 * E:1 * E].astype(q_ref.dtype)    # lane-aligned E-wide slices
    k_ref[0] = qkv[:, 1 * E:2 * E].astype(k_ref.dtype)
    v_ref[0] = qkv[:, 2 * E:3 * E].astype(v_ref.dtype)


# ------------------ kernel 2: causal flash attention --------------------------
# grid (B, H//G, S//TQ, S//TK); G heads per program (lane-dense G*D blocks);
# KV axis is the (innermost, "arbitrary") reduction.

def flash_attn_kernel(q_ref, k_ref, v_ref, o_ref, m_sc, l_sc, acc_sc,
                      *, scale, tq, tk, heads, head_dim):
    qi = pl.program_id(2)
    ki = pl.program_id(3)
    G, D = heads, head_dim

    @pl.when(ki == 0)
    def _():
        m_sc[...] = jnp.full(m_sc.shape, _NEG_BIG, dtype=m_sc.dtype)
        l_sc[...] = jnp.zeros(l_sc.shape, dtype=l_sc.dtype)
        acc_sc[...] = jnp.zeros(acc_sc.shape, dtype=acc_sc.dtype)

    q_start = qi * tq
    k_start = ki * tk

    def process(apply_mask):
        q = q_ref[0]                                      # (TQ, G*D) bf16
        k = k_ref[0]                                      # (TK, G*D) bf16
        v = v_ref[0]                                      # (TK, G*D) bf16
        if apply_mask:                                    # mask built once per tile
            q_pos = q_start + jax.lax.broadcasted_iota(jnp.int32, (tq, tk), 0)
            k_pos = k_start + jax.lax.broadcasted_iota(jnp.int32, (tq, tk), 1)
            keep = q_pos >= k_pos
        for h in range(G):                                # static, small loop
            sl = slice(h * D, (h + 1) * D)
            # q_h @ k_h^T without explicit transpose: contract last dims of both.
            s = jax.lax.dot_general(q[:, sl], k[:, sl], (((1,), (1,)), ((), ())),
                                    preferred_element_type=jnp.float32) * scale
            if apply_mask:
                s = jnp.where(keep, s, _NEG_BIG)
            m_prev = m_sc[h]
            m_new = jnp.maximum(m_prev, jnp.max(s, axis=-1, keepdims=True))
            alpha = jnp.exp(m_prev - m_new)
            p = jnp.exp(s - m_new)
            l_sc[h] = alpha * l_sc[h] + jnp.sum(p, axis=-1, keepdims=True)
            acc_sc[h] = alpha * acc_sc[h] + jnp.dot(
                p.astype(jnp.bfloat16), v[:, sl], preferred_element_type=jnp.float32)
            m_sc[h] = m_new
        # attn_drop: identity (eval mode)

    fully_visible = k_start + tk - 1 <= q_start           # whole KV tile in the past
    on_diagonal = jnp.logical_and(jnp.logical_not(fully_visible),
                                  k_start <= q_start + tq - 1)
    # Fully-masked future tiles: both conditions false -> compute skipped,
    # DMAs deduped via the clamped kv index_map.
    # TODO(synk): flatten (i,j) to a lower-triangular grid via scalar-prefetch
    # lookup tables to also remove the ~0.35us step overhead of skipped tiles.

    @pl.when(fully_visible)
    def _():
        process(False)                                    # mask-free fast path

    @pl.when(on_diagonal)
    def _():
        process(True)

    @pl.when(ki == pl.num_programs(3) - 1)
    def _():
        outs = []
        for h in range(G):
            inv_l = pl.reciprocal(l_sc[h], approx=True)   # EUP slot
            outs.append(acc_sc[h] * inv_l)
        merged = outs[0] if G == 1 else jnp.concatenate(outs, axis=-1)
        o_ref[0] = merged.astype(o_ref.dtype)             # single lane-dense store


# ---- kernel 3: out-proj + residual + LN2 + MLP (streamed over hidden) + residual
# grid (B, S//TS, F//TF); hidden axis is the reduction; wp/x/y blocks are
# constant across it so their DMAs are deduped by the pipeline.

def proj_mlp_kernel(x_ref, y_ref, wp_ref, bp_ref, g_ref, b_ref,
                    w1_ref, b1_ref, w2_ref, b2_ref, o_ref, h_ref, acc_ref):
    f = pl.program_id(2)

    @pl.when(f == 0)
    def _():
        x1 = (x_ref[0]
              + jnp.dot(y_ref[0], wp_ref[...], preferred_element_type=jnp.float32)
              + bp_ref[...])                              # residual + proj bias
        # resid_drop: identity (eval mode)
        h_ref[...] = _layernorm(x1, g_ref[...], b_ref[...]).astype(jnp.bfloat16)
        acc_ref[...] = x1 + b2_ref[...]                   # second residual + fc2 bias

    t = jnp.dot(h_ref[...], w1_ref[...],
                preferred_element_type=jnp.float32) + b1_ref[...]
    t = _gelu_exact(t)                                    # f32 elementwise (VPU/EUP)
    acc_ref[...] += jnp.dot(t.astype(jnp.bfloat16), w2_ref[...],
                            preferred_element_type=jnp.float32)
    # mlp Dropout: identity (eval mode)

    @pl.when(f == pl.num_programs(2) - 1)
    def _():
        o_ref[0] = acc_ref[...].astype(o_ref.dtype)


# --------------------------------- wrapper ------------------------------------

def gpt_block(x, params, n_heads, *, ts=256, tq=256, tk=256, tf=512,
              compute_dtype=jnp.bfloat16):
    B, S, E = x.shape
    H = n_heads
    assert E % H == 0
    D = E // H
    F = params["w1"].shape[1]

    TS, TQ, TK, TF = min(ts, S), min(tq, S), min(tk, S), min(tf, F)
    assert S % TS == 0 and S % TQ == 0 and S % TK == 0 and F % TF == 0

    G = _pick_head_group(H, D)            # heads per attention program
    NG = H // G
    GD = G * D

    cd = compute_dtype
    vmem_limit = _vmem_limit_bytes()

    # ---- pre-pack weights (one-time, outside the kernels) ----
    wqkv = jnp.concatenate([params["wq"], params["wk"], params["wv"]], axis=1).astype(cd)   # (E,3E)
    bqkv = jnp.concatenate([params["bq"], params["bk"], params["bv"]], axis=1).astype(jnp.float32)  # (1,3E)
    wp = params["wp"].astype(cd)                                                            # (E,E)
    w1 = params["w1"].astype(cd)                                                            # (E,F)
    w2 = params["w2"].astype(cd)                                                            # (F,E)

    # ---- kernel 1: LN1 + fused QKV projection -> q,k,v in lane-dense (B,S,E) ----
    ce_qkv = pl.CostEstimate(
        flops=int(2 * B * S * E * 3 * E),
        transcendentals=0,
        bytes_accessed=int(B * S * E * 4 + 3 * E * E * 2 + 3 * B * S * E * 2))
    q, k, v = pl.pallas_call(
        functools.partial(qkv_proj_kernel, n_embd=E),
        out_shape=(jax.ShapeDtypeStruct((B, S, E), cd),) * 3,
        grid_spec=pltpu.PrefetchScalarGridSpec(
            num_scalar_prefetch=0,
            grid=(B, S // TS),
            in_specs=[
                pl.BlockSpec((1, TS, E), lambda b, s: (b, s, 0)),
                pl.BlockSpec((1, E), lambda b, s: (0, 0)),
                pl.BlockSpec((1, E), lambda b, s: (0, 0)),
                pl.BlockSpec((E, 3 * E), lambda b, s: (0, 0)),
                pl.BlockSpec((1, 3 * E), lambda b, s: (0, 0)),
            ],
            out_specs=[pl.BlockSpec((1, TS, E), lambda b, s: (b, s, 0))] * 3,
        ),
        compiler_params=_cparams(("parallel", "parallel"), vmem_limit),
        cost_estimate=ce_qkv,
    )(x, params["ln1_g"], params["ln1_b"], wqkv, bqkv)

    # ---- kernel 2: causal flash attention (G heads / program) ----
    def _kv_index_map(b, g, i, j):
        # Clamp future (fully-masked) KV tiles to the last useful tile so their
        # DMAs are deduped by the pipeline.
        j_last = (i * TQ + TQ - 1) // TK
        return (b, jnp.minimum(j, j_last), g)

    ce_attn = pl.CostEstimate(
        flops=int(4 * B * H * S * S * D),
        transcendentals=int(B * H * S * S),
        bytes_accessed=int(4 * B * S * E * 2))
    y = pl.pallas_call(
        functools.partial(flash_attn_kernel, scale=1.0 / math.sqrt(D),
                          tq=TQ, tk=TK, heads=G, head_dim=D),
        out_shape=jax.ShapeDtypeStruct((B, S, E), cd),
        grid_spec=pltpu.PrefetchScalarGridSpec(
            num_scalar_prefetch=0,
            grid=(B, NG, S // TQ, S // TK),
            in_specs=[
                pl.BlockSpec((1, TQ, GD), lambda b, g, i, j: (b, i, g)),
                pl.BlockSpec((1, TK, GD), _kv_index_map),
                pl.BlockSpec((1, TK, GD), _kv_index_map),
            ],
            out_specs=pl.BlockSpec((1, TQ, GD), lambda b, g, i, j: (b, i, g)),
            scratch_shapes=[pltpu.VMEM((G, TQ, 1), jnp.float32),
                            pltpu.VMEM((G, TQ, 1), jnp.float32),
                            pltpu.VMEM((G, TQ, D), jnp.float32)],
        ),
        compiler_params=_cparams(("parallel", "parallel", "parallel", "arbitrary"),
                                 vmem_limit),
        cost_estimate=ce_attn,
    )(q, k, v)

    # ---- kernel 3: out-proj + residual + LN2 + MLP (streamed over 4E) + residual ----
    ce_pm = pl.CostEstimate(
        flops=int(2 * B * S * E * E + 4 * B * S * E * F),
        transcendentals=int(B * S * F),
        bytes_accessed=int(B * S * E * (4 + 2 + 4) + (E * E + 2 * E * F) * 2))
    out = pl.pallas_call(
        proj_mlp_kernel,
        out_shape=jax.ShapeDtypeStruct((B, S, E), x.dtype),
        grid_spec=pltpu.PrefetchScalarGridSpec(
            num_scalar_prefetch=0,
            grid=(B, S // TS, F // TF),
            in_specs=[
                pl.BlockSpec((1, TS, E), lambda b, s, f: (b, s, 0)),   # x
                pl.BlockSpec((1, TS, E), lambda b, s, f: (b, s, 0)),   # y
                pl.BlockSpec((E, E), lambda b, s, f: (0, 0)),          # wp
                pl.BlockSpec((1, E), lambda b, s, f: (0, 0)),          # bp
                pl.BlockSpec((1, E), lambda b, s, f: (0, 0)),          # ln2_g
                pl.BlockSpec((1, E), lambda b, s, f: (0, 0)),          # ln2_b
                pl.BlockSpec((E, TF), lambda b, s, f: (0, f)),         # w1 slab
                pl.BlockSpec((1, TF), lambda b, s, f: (0, f)),         # b1 slab
                pl.BlockSpec((TF, E), lambda b, s, f: (f, 0)),         # w2 slab
                pl.BlockSpec((1, E), lambda b, s, f: (0, 0)),          # b2
            ],
            out_specs=pl.BlockSpec((1, TS, E), lambda b, s, f: (b, s, 0)),
            scratch_shapes=[pltpu.VMEM((TS, E), jnp.bfloat16),
                            pltpu.VMEM((TS, E), jnp.float32)],
        ),
        compiler_params=_cparams(("parallel", "parallel", "arbitrary"), vmem_limit),
        cost_estimate=ce_pm,
    )(x, y, wp, params["bp"], params["ln2_g"], params["ln2_b"],
      w1, params["b1"], w2, params["b2"])

    return out


# --------------------------- deterministic params -----------------------------

def init_params(key, n_embd):
    ks = jax.random.split(key, 6)
    std = 0.02
    E = n_embd
    # Linear weights stored already transposed to (in, out) so the kernels do x @ W + b.
    return {
        "ln1_g": jnp.ones((1, E), jnp.float32),
        "ln1_b": jnp.zeros((1, E), jnp.float32),
        "wq": std * jax.random.normal(ks[0], (E, E), jnp.float32),
        "bq": jnp.zeros((1, E), jnp.float32),
        "wk": std * jax.random.normal(ks[1], (E, E), jnp.float32),
        "bk": jnp.zeros((1, E), jnp.float32),
        "wv": std * jax.random.normal(ks[2], (E, E), jnp.float32),
        "bv": jnp.zeros((1, E), jnp.float32),
        "wp": std * jax.random.normal(ks[3], (E, E), jnp.float32),
        "bp": jnp.zeros((1, E), jnp.float32),
        "ln2_g": jnp.ones((1, E), jnp.float32),
        "ln2_b": jnp.zeros((1, E), jnp.float32),
        "w1": std * jax.random.normal(ks[4], (E, 4 * E), jnp.float32),
        "b1": jnp.zeros((1, 4 * E), jnp.float32),
        "w2": std * jax.random.normal(ks[5], (4 * E, E), jnp.float32),
        "b2": jnp.zeros((1, E), jnp.float32),
    }


# ------------------------------ pure-JAX reference -----------------------------

def reference_block(x, p, n_heads):
    def ln(x, g, b):
        mu = jnp.mean(x, axis=-1, keepdims=True)
        var = jnp.mean((x - mu) ** 2, axis=-1, keepdims=True)
        return (x - mu) * jax.lax.rsqrt(var + 1e-5) * g + b

    B, S, E = x.shape
    D = E // n_heads
    h = ln(x, p["ln1_g"], p["ln1_b"])
    q = (h @ p["wq"] + p["bq"]).reshape(B, S, n_heads, D).transpose(0, 2, 1, 3)
    k = (h @ p["wk"] + p["bk"]).reshape(B, S, n_heads, D).transpose(0, 2, 1, 3)
    v = (h @ p["wv"] + p["bv"]).reshape(B, S, n_heads, D).transpose(0, 2, 1, 3)
    attn = jnp.einsum("bhqd,bhkd->bhqk", q, k) / math.sqrt(D)
    mask = jnp.tril(jnp.ones((S, S), bool))
    attn = jnp.where(mask[None, None], attn, -jnp.inf)
    attn = jax.nn.softmax(attn, axis=-1)
    y = jnp.einsum("bhqk,bhkd->bhqd", attn, v).transpose(0, 2, 1, 3).reshape(B, S, E)
    x = x + (y @ p["wp"] + p["bp"])
    h2 = ln(x, p["ln2_g"], p["ln2_b"])
    m = jax.nn.gelu(h2 @ p["w1"] + p["b1"], approximate=False) @ p["w2"] + p["b2"]
    return x + m


# ----------------------------------- main --------------------------------------

if __name__ == "__main__":
    key = jax.random.PRNGKey(0)
    k_x, k_p = jax.random.split(key)

    # Small but tile-friendly shapes; tiles chosen < S and < 4E so the flash
    # accumulation, causal skip / fast-path / diagonal branches and the MLP
    # hidden-dim streaming are all exercised.  D=32 -> head group G=4 (lane-dense).
    B, S, E, H = 2, 128, 128, 4
    x = jax.random.normal(k_x, (B, S, E), jnp.float32)
    params = init_params(k_p, E)

    out = gpt_block(x, params, n_heads=H, ts=64, tq=64, tk=64, tf=256)
    out = jax.block_until_ready(out)

    ref = reference_block(x, params, H)
    assert out.shape == (B, S, E)
    # bf16 matmul inputs with f32 accumulation -> bf16-level tolerance vs f32 reference.
    assert jnp.allclose(out, ref, atol=1e-2, rtol=1e-2), "mismatch vs JAX reference"

    print("KERNEL_OK")
</pallas_src>

<mosaic_0001>
module attributes {stable_mosaic.version = 11 : i64} {
  func.func @qkv_proj_kernel(%arg0: i32, %arg1: i32, %arg2: memref<1x64x128xf32, #tpu.memory_space<vmem>>, %arg3: memref<1x128xf32, #tpu.memory_space<vmem>>, %arg4: memref<1x128xf32, #tpu.memory_space<vmem>>, %arg5: memref<128x384xbf16, #tpu.memory_space<vmem>>, %arg6: memref<1x384xf32, #tpu.memory_space<vmem>>, %arg7: memref<1x64x128xbf16, #tpu.memory_space<vmem>>, %arg8: memref<1x64x128xbf16, #tpu.memory_space<vmem>>, %arg9: memref<1x64x128xbf16, #tpu.memory_space<vmem>>) attributes {dimension_semantics = [#tpu.dimension_semantics<parallel>, #tpu.dimension_semantics<parallel>], iteration_bounds = array<i64: 2, 2>, scalar_prefetch = 0 : i64, scratch_operands = 0 : i64, tpu.core_type = #tpu.core_type<tc>, window_params = [{transform_indices = @transform_0, window_bounds = array<i64: 1, 64, 128>}, {pipeline_mode = #tpu.pipeline_mode<synchronous>, transform_indices = @transform_1, window_bounds = array<i64: 1, 128>}, {pipeline_mode = #tpu.pipeline_mode<synchronous>, transform_indices = @transform_2, window_bounds = array<i64: 1, 128>}, {pipeline_mode = #tpu.pipeline_mode<synchronous>, transform_indices = @transform_3, window_bounds = array<i64: 128, 384>}, {pipeline_mode = #tpu.pipeline_mode<synchronous>, transform_indices = @transform_4, window_bounds = array<i64: 1, 384>}, {transform_indices = @transform_5, window_bounds = array<i64: 1, 64, 128>}, {transform_indices = @transform_6, window_bounds = array<i64: 1, 64, 128>}, {transform_indices = @transform_7, window_bounds = array<i64: 1, 64, 128>}]} {
    %c0 = arith.constant 0 : index
    %c0_0 = arith.constant 0 : index
    %c0_1 = arith.constant 0 : index
    %0 = vector.load %arg2[%c0, %c0_0, %c0_1] : memref<1x64x128xf32, #tpu.memory_space<vmem>>, vector<1x64x128xf32>
    %1 = vector.shape_cast %0 : vector<1x64x128xf32> to vector<64x128xf32>
    %c0_2 = arith.constant 0 : index
    %c0_3 = arith.constant 0 : index
    %2 = vector.load %arg3[%c0_2, %c0_3] : memref<1x128xf32, #tpu.memory_space<vmem>>, vector<1x128xf32>
    %c0_4 = arith.constant 0 : index
    %c0_5 = arith.constant 0 : index
    %3 = vector.load %arg4[%c0_4, %c0_5] : memref<1x128xf32, #tpu.memory_space<vmem>>, vector<1x128xf32>
    %cst = arith.constant dense<0.000000e+00> : vector<64xf32>
    %4 = vector.multi_reduction <add>, %1, %cst [1] : vector<64x128xf32> to vector<64xf32>
    %5 = vector.shape_cast %4 : vector<64xf32> to vector<64x1xf32>
    %cst_6 = arith.constant 1.280000e+02 : f32
    %6 = vector.broadcast %cst_6 : f32 to vector<64x1xf32>
    %7 = arith.divf %5, %6 : vector<64x1xf32>
    %8 = vector.broadcast %7 : vector<64x1xf32> to vector<64x128xf32>
    %9 = arith.subf %1, %8 : vector<64x128xf32>
    %10 = arith.mulf %9, %9 : vector<64x128xf32>
    %cst_7 = arith.constant dense<0.000000e+00> : vector<64xf32>
    %11 = vector.multi_reduction <add>, %10, %cst_7 [1] : vector<64x128xf32> to vector<64xf32>
    %12 = vector.shape_cast %11 : vector<64xf32> to vector<64x1xf32>
    %cst_8 = arith.constant 1.280000e+02 : f32
    %13 = vector.broadcast %cst_8 : f32 to vector<64x1xf32>
    %14 = arith.divf %12, %13 : vector<64x1xf32>
    %cst_9 = arith.constant 9.99999974E-6 : f32
    %15 = vector.broadcast %cst_9 : f32 to vector<64x1xf32>
    %16 = arith.addf %14, %15 : vector<64x1xf32>
    %17 = math.rsqrt %16 : vector<64x1xf32>
    %18 = vector.broadcast %17 : vector<64x1xf32> to vector<64x128xf32>
    %19 = arith.mulf %9, %18 : vector<64x128xf32>
    %20 = vector.broadcast %2 : vector<1x128xf32> to vector<64x128xf32>
    %21 = arith.mulf %19, %20 : vector<64x128xf32>
    %22 = vector.broadcast %3 : vector<1x128xf32> to vector<64x128xf32>
    %23 = arith.addf %21, %22 : vector<64x128xf32>
    %24 = arith.truncf %23 : vector<64x128xf32> to vector<64x128xbf16>
    %c0_10 = arith.constant 0 : index
    %c0_11 = arith.constant 0 : index
    %25 = vector.load %arg5[%c0_10, %c0_11] : memref<128x384xbf16, #tpu.memory_space<vmem>>, vector<128x384xbf16>
    %cst_12 = arith.constant dense<0.000000e+00> : vector<64x384xf32>
    %26 = tpu.matmul %24, %25, %cst_12 {dimension_numbers = #tpu.dot_dimension_numbers<[1], [0], [0], [1], [0, 0, 1, 1], [], []>} : vector<64x128xbf16>, vector<128x384xbf16>, vector<64x384xf32> -> vector<64x384xf32>
    %c0_13 = arith.constant 0 : index
    %c0_14 = arith.constant 0 : index
    %27 = vector.load %arg6[%c0_13, %c0_14] : memref<1x384xf32, #tpu.memory_space<vmem>>, vector<1x384xf32>
    %28 = vector.broadcast %27 : vector<1x384xf32> to vector<64x384xf32>
    %29 = arith.addf %26, %28 : vector<64x384xf32>
    %30 = vector.extract_strided_slice %29 {offsets = [0, 0], sizes = [64, 128], strides = [1, 1]} : vector<64x384xf32> to vector<64x128xf32>
    %31 = arith.truncf %30 : vector<64x128xf32> to vector<64x128xbf16>
    %c0_15 = arith.constant 0 : index
    %c0_16 = arith.constant 0 : index
    %c0_17 = arith.constant 0 : index
    %32 = vector.load %arg7[%c0_15, %c0_16, %c0_17] : memref<1x64x128xbf16, #tpu.memory_space<vmem>>, vector<1x64x128xbf16>
    %33 = vector.shape_cast %32 : vector<1x64x128xbf16> to vector<64x128xbf16>
    %34 = vector.shape_cast %31 : vector<64x128xbf16> to vector<1x64x128xbf16>
    tpu.vector_store %arg7[%c0_15, %c0_16, %c0_17], %34 {strides = array<i32>} : memref<1x64x128xbf16, #tpu.memory_space<vmem>>, vector<1x64x128xbf16>,
    %35 = vector.extract_strided_slice %29 {offsets = [0, 128], sizes = [64, 128], strides = [1, 1]} : vector<64x384xf32> to vector<64x128xf32>
    %36 = arith.truncf %35 : vector<64x128xf32> to vector<64x128xbf16>
    %c0_18 = arith.constant 0 : index
    %c0_19 = arith.constant 0 : index
    %c0_20 = arith.constant 0 : index
    %37 = vector.load %arg8[%c0_18, %c0_19, %c0_20] : memref<1x64x128xbf16, #tpu.memory_space<vmem>>, vector<1x64x128xbf16>
    %38 = vector.shape_cast %37 : vector<1x64x128xbf16> to vector<64x128xbf16>
    %39 = vector.shape_cast %36 : vector<64x128xbf16> to vector<1x64x128xbf16>
    tpu.vector_store %arg8[%c0_18, %c0_19, %c0_20], %39 {strides = array<i32>} : memref<1x64x128xbf16, #tpu.memory_space<vmem>>, vector<1x64x128xbf16>,
    %40 = vector.extract_strided_slice %29 {offsets = [0, 256], sizes = [64, 128], strides = [1, 1]} : vector<64x384xf32> to vector<64x128xf32>
    %41 = arith.truncf %40 : vector<64x128xf32> to vector<64x128xbf16>
    %c0_21 = arith.constant 0 : index
    %c0_22 = arith.constant 0 : index
    %c0_23 = arith.constant 0 : index
    %42 = vector.load %arg9[%c0_21, %c0_22, %c0_23] : memref<1x64x128xbf16, #tpu.memory_space<vmem>>, vector<1x64x128xbf16>
    %43 = vector.shape_cast %42 : vector<1x64x128xbf16> to vector<64x128xbf16>
    %44 = vector.shape_cast %41 : vector<64x128xbf16> to vector<1x64x128xbf16>
    tpu.vector_store %arg9[%c0_21, %c0_22, %c0_23], %44 {strides = array<i32>} : memref<1x64x128xbf16, #tpu.memory_space<vmem>>, vector<1x64x128xbf16>,
    return
  }
  func.func @transform_0(%arg0: i32, %arg1: i32) -> (i32, i32, i32) {
    %c0_i32 = arith.constant 0 : i32
    %c0_i32_0 = arith.constant 0 : i32
    return %arg0, %arg1, %c0_i32 : i32, i32, i32
  }
  func.func @transform_1(%arg0: i32, %arg1: i32) -> (i32, i32) {
    %c0_i32 = arith.constant 0 : i32
    %c0_i32_0 = arith.constant 0 : i32
    %c0_i32_1 = arith.constant 0 : i32
    return %c0_i32, %c0_i32_0 : i32, i32
  }
  func.func @transform_2(%arg0: i32, %arg1: i32) -> (i32, i32) {
    %c0_i32 = arith.constant 0 : i32
    %c0_i32_0 = arith.constant 0 : i32
    %c0_i32_1 = arith.constant 0 : i32
    return %c0_i32, %c0_i32_0 : i32, i32
  }
  func.func @transform_3(%arg0: i32, %arg1: i32) -> (i32, i32) {
    %c0_i32 = arith.constant 0 : i32
    %c0_i32_0 = arith.constant 0 : i32
    %c0_i32_1 = arith.constant 0 : i32
    return %c0_i32, %c0_i32_0 : i32, i32
  }
  func.func @transform_4(%arg0: i32, %arg1: i32) -> (i32, i32) {
    %c0_i32 = arith.constant 0 : i32
    %c0_i32_0 = arith.constant 0 : i32
    %c0_i32_1 = arith.constant 0 : i32
    return %c0_i32, %c0_i32_0 : i32, i32
  }
  func.func @transform_5(%arg0: i32, %arg1: i32) -> (i32, i32, i32) {
    %c0_i32 = arith.constant 0 : i32
    %c0_i32_0 = arith.constant 0 : i32
    return %arg0, %arg1, %c0_i32 : i32, i32, i32
  }
  func.func @transform_6(%arg0: i32, %arg1: i32) -> (i32, i32, i32) {
    %c0_i32 = arith.constant 0 : i32
    %c0_i32_0 = arith.constant 0 : i32
    return %arg0, %arg1, %c0_i32 : i32, i32, i32
  }
  func.func @transform_7(%arg0: i32, %arg1: i32) -> (i32, i32, i32) {
    %c0_i32 = arith.constant 0 : i32
    %c0_i32_0 = arith.constant 0 : i32
    return %arg0, %arg1, %c0_i32 : i32, i32, i32
  }
}

</mosaic_0001>

<bundles_post_ra>
// kernel: tpu_custom_call.1
= control target key start
LH: loop header
LB: loop body
LE: loop exit
PB: predicated region body
PF: predicated region fallthrough
CT: control target
= control target key end

     0   :  { %s2140_s0 = inlined_call_operand.hbm [shape: f32[2,128,128], index: 0, kind: input, shape index: {}]   ;;  %s2141_s1 = inlined_call_operand.vmem [shape: f32[1,128], index: 1, kind: input, shape index: {}]   ;;  %s2142_s2 = inlined_call_operand.vmem [shape: f32[1,128], index: 2, kind: input, shape index: {}]   ;;  %s2143_s3 = inlined_call_operand.hbm [shape: bf16[128,384], index: 3, kind: input, shape index: {}]   ;;  %s2144_s4 = inlined_call_operand.vmem [shape: f32[1,384], index: 4, kind: input, shape index: {}]   ;;  %s2145_s5 = inlined_call_operand.hbm [shape: bf16[2,128,128], index: 5, kind: output, shape index: {0}]   ;;  %s2146_s6 = inlined_call_operand.hbm [shape: bf16[2,128,128], index: 6, kind: output, shape index: {1}]   ;;  %s2147_s7 = inlined_call_operand.hbm [shape: bf16[2,128,128], index: 7, kind: output, shape index: {2}]  }
   0x1   :  { %2158 = sst [smem:[#allocation20_spill]] %s2140_s0 }
   0x2   :  { %2159 = sst [smem:[#allocation21_spill]] %s2141_s1 }
   0x3   :  { %2160 = sst [smem:[#allocation22_spill]] %s2143_s3 }
   0x4   :  { %2161 = sst [smem:[#allocation23_spill]] %s2145_s5 }
   0x5   :  { %2162 = sst [smem:[#allocation24_spill]] %s2146_s6 }
   0x6   :  { %2163 = sst [smem:[#allocation25_spill]] %s2147_s7 }
   0x7   :  { %13 = vsyncpa [#allocation3], 0 }
   0x8   :  { %15 = vsyncpa [#allocation3 + $0x1], 0 }
   0x9   :  { %16 = vsyncpa [#allocation6], 0 }
   0xa   :  { %17 = vsyncpa [#allocation4], 0 }
   0xb   :  { %19 = vsyncpa [#allocation4 + $0x1], 0 }
   0xc   :  { %20 = vsyncpa [#allocation9], 0 }
   0xd   :  { %22 = vsyncpa [#allocation9 + $0x1], 0  ;;  %s1778_s24 = smov 0   ;;  %s1780_s25 = smov 0  }
   0xe   :  { %s1782_s26 = smov 0   ;;  %s1784_s27 = smov 0  }
   0xf   :  { %s1786_s28 = smov 0   ;;  %s1788_s29 = smov 0  }
  0x10   :  { %s1790_s30 = smov 0   ;;  %s1792_s8 = smov 0  }
  0x11 LB: > { %2164 = sst [smem:[#allocation15_spill]] %s1696_s24  ;;  %s1819_s9 = sadd.s32 4294967295, %s1724_s8   ;;  %s1724_s8 = sphi %s1792_s8, %s28_s8   ;;  %s1720_s30 = sphi %s1790_s30, %s2195_s30   ;;  %s1716_s29 = sphi %s1788_s29, %s2190_s29   ;;  %s1712_s28 = sphi %s1786_s28, %s2194_s28   ;;  %s1708_s27 = sphi %s1784_s27, %s2189_s27   ;;  %s1704_s26 = sphi %s1782_s26, %s2193_s26   ;;  %s1700_s25 = sphi %s1780_s25, %s2192_s25   ;;  %s1696_s24 = sphi %s1778_s24, %s2191_s24  }
  0x12   : > { %2165 = sst [smem:[#allocation16_spill]] %s1716_s29  ;;  %s2148_s10 = sadd.s32 4294967294, %s1724_s8  }
  0x13   : > { %p62_p0 = scmp.ne.s32.totalorder %s1700_s25, %s1696_s24  ;;  %p63_p1 = scmp.eq.s32.totalorder %s1819_s9, 0 }
  0x14   : > { %p178_p3 = scmp.eq.s32.totalorder %s2148_s10, 3  ;;  %p1154_p5 = scmp.ge.s32.totalorder %s1724_s8, 1 }
  0x15   : > { %p1830_p4 = por %p63_p1, %p62_p0  ;;  %p241_p7 = scmp.lt.s32.totalorder %s1724_s8, 5 }
  0x16   : > { %p1835_p6 = por %p178_p3, %p62_p0  ;;  %s1726_s14 = smov [#allocation5]  }
  0x17   : > { %p1840_p8 = pnand %p1154_p5, %p241_p7  ;;  %s259_s15 = sshll.u32 %s1726_s14, 4  ;;  %s260_s15 = int_to_ptr.vmem [resolvable:$true] %s259_s15 }
  0x18   : > { %s2167_s12 = scalar_select %p1835_p6, 1, 0 }
  0x19   : > { %p1372_p9 = pneg %p1840_p8  ;;  %s1525_s16 = scalar_lea.vmem %s260_s15, 3072 }
  0x1a   : > { %2168 = sst [smem:[#allocation17_spill]] %s2167_s12  ;;  %p1526_p12 = scmp.ne.s32.totalorder %s260_s15, %s1525_s16 }
  0x1b   : > { %p1373_p10 = pnand %p1372_p9, %p63_p1  ;;  %p1533_p3 = scmp.lt.s32.totalorder %s260_s15, %s260_s15 }
  0x1c   : > { %p1534_p2 = scmp.lt.s32.totalorder %s1525_s16, %s1525_s16 }
  0x1d   : > { %p1516_p11 = pneg %p1373_p10 }
  0x1e   : > { %p1535_p6 = por %p1534_p2, %p1533_p3 }
  0x1f   : > { %p1528_p13 = pnand %p1526_p12, %p1516_p11 }
  0x21   : > { %p1529_p0 = pneg %p1528_p13 }
  0x23   : > { %p1536_p5 = pnand %p1535_p6, %p1529_p0 }
  0x25   : > { %1539 = shalt.err (!%p1536_p5)
}
  0x26   : > { %s1727_s17 = smov 192   ;;  %s1728_s18 = smov 12  }
  0x27   : > { %s2170_s3 = sld [smem:[#allocation22_spill]]  ;;  %s37_s21 = sadd.s32 1, %s1716_s29 }
  0x28   : > { %p38_p2 = scmp.ge.s32.totalorder %s37_s21, 2  ;;  %s40_s22 = sadd.s32 1, %s1720_s30 }
  0x29   : > { %s49_s23 = sadd.s32 1, %s1704_s26  ;;  %p56_p6 = scmp.ne.s32.totalorder %s1704_s26, %s1700_s25 }
  0x2a   : > { %s2197_s21 = smov (%p38_p2, %s37_s21), 0  ;;  %s2199_s22 = smov (!%p38_p2, %s40_s22), %s1720_s30 }
  0x2b   : > { %2171 = sst [smem:[#allocation18_spill]] %s2197_s21  ;;  %s45_s14 = ssub.s32 %s1716_s29, %s2197_s21 }
  0x2c   : > { %p57_p7 = scmp.eq.s32.totalorder %s1724_s8, 0  ;;  %p42_p9 = scmp.ge.s32.totalorder %s2199_s22, 2 }
  0x2d   : > { %1375 = dma.hbm_to_vmem [thread:$0]  (!%p1373_p10), %s2170_s3, 3072, %s260_s15, [#allocation6], %s1727_s17, %s1727_s17, %s1728_s18  }
  0x2e   : > { %p2172_p11 = scmp.eq.s32.totalorder %s1819_s9, 3  ;;  %p1868_p10 = por %p57_p7, %p56_p6 }
  0x2f   : > { %p1391_p13 = scmp.lt.s32.totalorder %s1724_s8, 4  ;;  %s2201_s22 = smov (%p42_p9, %s2199_s22), 0 }
  0x30   : > { %p1864_p12 = por %p2172_p11, %p56_p6  ;;  %s276_s17 = sand.u32 1, %s1704_s26  }
  0x31   : > { %s1158_s18 = sshll.u32 %s1716_s29, 3  ;;  %s44_s19 = ssub.s32 %s1720_s30, %s2201_s22 }
  0x32   : > { %s2173_s16 = scalar_select %p1864_p12, 1, 0 }
  0x33   : > { %s46_s20 = sor.u32 %s45_s14, %s44_s19  ;;  %s1157_s10 = sshll.u32 %s276_s17, 6 }
  0x34   : > { %2174 = sst [smem:[#allocation19_spill]] %s2173_s16  ;;  %p47_p0 = scmp.eq.s32.totalorder %s46_s20, 0 }
  0x35   : > { %s1159_s3 = sshll.u32 %s1720_s30, 4  ;;  %s280_s21 = scalar_lea.vmem [#allocation2], %s1157_s10 }
  0x36   : > { %s289_s12 = sshll.u32 %s280_s21, 4  ;;  %s286_s7 = sadd.s32 %s1159_s3, %s1158_s18  ;;  %s290_s12 = int_to_ptr.vmem [resolvable:$true] %s289_s12 }
  0x37   : > { %s1881_s24 = scalar_select %p47_p0, %s1704_s26, %s49_s23  }
  0x38   : > { %s1160_s6 = sshll.u32 %s286_s7, 7  ;;  %p1887_p3 = pnand %p1391_p13, %p1868_p10 }
  0x39   : > { %s2177_s0 = sld [smem:[#allocation20_spill]]  ;;  %s277_s19 = scalar_lea.sflag [#allocation3], %s276_s17 }
  0x3a   : > { %p1542_p5 = pneg %p1887_p3  ;;  %s1553_s10 = scalar_lea.vmem %s290_s12, 1024 }
  0x3b   : > { %p1554_p2 = scmp.ne.s32.totalorder %s290_s12, %s1553_s10  ;;  %s1729_s3 = smov [#allocation2]  }
  0x3c   : > { %s1558_s7 = sshll.u32 %s1729_s3, 4  ;;  %s1559_s7 = int_to_ptr.vmem [resolvable:$false] %s1558_s7 }
  0x3d   : > { %p1556_p6 = pnand %p1554_p2, %p1542_p5  ;;  %s1560_s21 = scalar_lea.vmem %s1559_s7, 2048 }
  0x3e   : > { %p1561_p9 = scmp.lt.s32.totalorder %s290_s12, %s1559_s7  ;;  %p1562_p11 = scmp.lt.s32.totalorder %s1560_s21, %s1553_s10 }
  0x3f   : > { %s288_s14 = scalar_lea.hbm %s2177_s0, %s1160_s6  ;;  %p1557_p7 = pneg %p1556_p6 }
  0x40   : > { %p1563_p10 = por %p1562_p11, %p1561_p9 }
  0x42   : > { %p1564_p13 = pnand %p1563_p10, %p1557_p7 }
  0x44   : > { %1567 = shalt.err (!%p1564_p13)
}
  0x45   : > { %s1730_s23 = smov 128   ;;  %s1731_s29 = smov 8  }
  0x46   : > { %1379 = dma.hbm_to_vmem [thread:$0]  (!%p1887_p3), %s288_s14, 1024, %s290_s12, %s277_s19, %s1730_s23, %s1730_s23, %s1731_s29  }
  0x47   : > { %301 = sbr.rel (%p1840_p8) target bundleno = 681 (0x2a9), region = 40  ;;  %s1901_s6 = sand.u32 (!%p1840_p8), 1, %s1700_s25  }
  0x48   : > { %s1162_s16 = sshll.u32 (!%p1840_p8), %s1901_s6, 6  ;;  %s304_s15 = scalar_lea.sflag (!%p1840_p8), [#allocation3], %s1901_s6 }
  0x49   : > { %s307_s17 = scalar_lea.vmem (!%p1840_p8), [#allocation2], %s1162_s16 }
  0x4c   : > { %1679 = dma.done.wait (%p1830_p4), %s304_s15, 1024  }
  0x4d   : > { %1681 = vsyncadd (%p1830_p4), %s304_s15, 4294966272 }
  0x4e   : > { %1683 = dma.done.wait (%p63_p1), [#allocation6], 3072  }
  0x4f   : > { %1685 = vsyncadd (%p63_p1), [#allocation6], 4294964224  ;;  %v357_v0 = vld [vmem:[%s307_s17] sm:$0xff]  ;;  %v359_v1 = vld [vmem:[%s307_s17 + $0x10] sm:$0xff]  ;;  %v1732_v62 = vmov 0   ;;  %s2178_s1 = sld [smem:[#allocation21_spill]] }
  0x50   : > { %367 = vadd.xlane.f32.xlu0 %v357_v0  ;;  %371 = vadd.xlane.f32.xlu1 %v359_v1  ;;  %v358_v2 = vld [vmem:[%s307_s17 + $0x8] sm:$0xff]  ;;  %v360_v3 = vld [vmem:[%s307_s17 + $0x18] sm:$0xff]  ;;  %v361_v4 = vld [vmem:[%s307_s17 + $0x20] sm:$0xff]  ;;  %s1164_s14 = sshll.u32 %s1901_s6, 5  ;;  %s1220_s7 = sshll.u32 %s1708_s27, 3 }
  0x51   : > { %v362_v5 = vld [vmem:[%s307_s17 + $0x28] sm:$0xff]  ;;  %v363_v6 = vld [vmem:[%s307_s17 + $0x30] sm:$0xff]  ;;  %v364_v7 = vld [vmem:[%s307_s17 + $0x38] sm:$0xff]  ;;  %697 = vmatprep.mubr.bf16.mxu0 %v1732_v62  ;;  %s1975_s19 = scalar_lea.vmem [#allocation7], %s1164_s14  ;;  %s1978_s10 = scalar_lea.vmem [#allocation8], %s1164_s14 }
  0x52   : > { %v1466_v8 = vld [vmem:[#allocation5 + $0xac] ss:$12 sps:$4 sm:$0xff]   ;;  %v1468_v9 = vld [vmem:[#allocation5 + $0xa8] ss:$12 sps:$4 sm:$0xff]   ;;  %v1471_v42 = vld [vmem:[#allocation5 + $0xb0] ss:$12 sps:$4 sm:$0xff]  }
  0x53   : > { %665 = vmatprep.subr.bf16.mxu0 %v1466_v8  ;;  %v1469_v41 = vld [vmem:[#allocation5 + $0x94] ss:$12 sps:$4 sm:$0xff]   ;;  %v1472_v43 = vld [vmem:[#allocation5 + $0x90] ss:$12 sps:$4 sm:$0xff]   ;;  %1336 = vmatprep.subr.bf16.mxu1 %v1471_v42  ;;  %v1475_v46 = vld [vmem:[#allocation5 + $0x98] ss:$12 sps:$4 sm:$0xff]  }
  0x54   : > { %369 = vadd.xlane.f32.xlu0 %v358_v2  ;;  %373 = vadd.xlane.f32.xlu1 %v360_v3  ;;  %v1473_v45 = vld [vmem:[#allocation5 + $0x7c] ss:$12 sps:$4 sm:$0xff]   ;;  %v1476_v47 = vld [vmem:[#allocation5 + $0x78] ss:$12 sps:$4 sm:$0xff]   ;;  %v1479_v49 = vld [vmem:[#allocation5 + $0x80] ss:$12 sps:$4 sm:$0xff]  }
  0x55   : > { %666 = vmatpush1.bf16.msra.mxu0 %v1468_v9  ;;  %1337 = vmatpush3.bf16.msra.mxu1 %v1471_v42  ;;  %v1477_v48 = vld [vmem:[#allocation5 + $0x64] ss:$12 sps:$4 sm:$0xff]   ;;  %v1480_v50 = vld [vmem:[#allocation5 + $0x60] ss:$12 sps:$4 sm:$0xff]   ;;  %v1483_v52 = vld [vmem:[#allocation5 + $0x68] ss:$12 sps:$4 sm:$0xff]  }
  0x56   : > { %667 = vmatprep.subr.bf16.mxu0 %v1469_v41  ;;  %1338 = vmatprep.subr.bf16.mxu1 %v1475_v46  ;;  %v1481_v51 = vld [vmem:[#allocation5 + $0x4c] ss:$12 sps:$4 sm:$0xff]   ;;  %v1484_v53 = vld [vmem:[#allocation5 + $0x48] ss:$12 sps:$4 sm:$0xff]   ;;  %v1487_v55 = vld [vmem:[#allocation5 + $0x50] ss:$12 sps:$4 sm:$0xff]  }
  0x57   : > { %v1485_v54 = vld [vmem:[#allocation5 + $0x34] ss:$12 sps:$4 sm:$0xff]   ;;  %v1488_v56 = vld [vmem:[#allocation5 + $0x30] ss:$12 sps:$4 sm:$0xff]   ;;  %v1491_v58 = vld [vmem:[#allocation5 + $0x38] ss:$12 sps:$4 sm:$0xff]  }
  0x58   : > { %375 = vadd.xlane.f32.xlu0 %v361_v4  ;;  %377 = vadd.xlane.f32.xlu1 %v362_v5  ;;  %v1489_v57 = vld [vmem:[#allocation5 + $0x1c] ss:$12 sps:$4 sm:$0xff]   ;;  %v1492_v59 = vld [vmem:[#allocation5 + $0x18] ss:$12 sps:$4 sm:$0xff]   ;;  %v1495_v61 = vld [vmem:[#allocation5 + $0x20] ss:$12 sps:$4 sm:$0xff]  }
  0x59   : > { %668 = vmatpush1.bf16.msra.mxu0 %v1472_v43  ;;  %1339 = vmatpush3.bf16.msra.mxu1 %v1475_v46  ;;  %v1493_v60 = vld [vmem:[#allocation5 + $0x4] ss:$12 sps:$4 sm:$0xff]   ;;  %v1496_v63 = vld [vmem:[#allocation5] ss:$12 sps:$4 sm:$0xff]   ;;  %s1982_s3 = scalar_lea.vmem [#allocation10], %s1164_s14  ;;  %s1221_s21 = sshll.u32 %s1712_s28, 4 }
  0x5a   : > { %669 = vmatprep.subr.bf16.mxu0 %v1473_v45  ;;  %1340 = vmatprep.subr.bf16.mxu1 %v1479_v49  ;;  %s949_s23 = sshll.u32 %s1975_s19, 4  ;;  %s967_s29 = sshll.u32 %s1978_s10, 4  ;;  %s2002_s23 = int_to_ptr.vmem [resolvable:$true] %s949_s23  ;;  %s2005_s29 = int_to_ptr.vmem [resolvable:$true] %s967_s29 }
  0x5b   : > { %s946_s16 = sadd.s32 %s1221_s21, %s1220_s7  ;;  %s985_s28 = sshll.u32 %s1982_s3, 4  ;;  %s2018_s28 = int_to_ptr.vmem [resolvable:$true] %s985_s28 }
  0x5c   : > { %379 = vadd.xlane.f32.xlu0 %v363_v6  ;;  %381 = vadd.xlane.f32.xlu1 %v364_v7  ;;  %s1222_s27 = sshll.u32 %s946_s16, 6  ;;  %s2180_s12 = sld [smem:[#allocation23_spill]] }
  0x5d   : > { %670 = vmatpush1.bf16.msra.mxu0 %v1476_v47  ;;  %1341 = vmatpush3.bf16.msra.mxu1 %v1479_v49  ;;  %s2181_s14 = sld [smem:[#allocation24_spill]]  ;;  %s924_s0 = scalar_lea.sflag [#allocation4], %s1901_s6 }
  0x5e   : > { %671 = vmatprep.subr.bf16.mxu0 %v1477_v48  ;;  %1342 = vmatprep.subr.bf16.mxu1 %v1483_v52  ;;  %s2182_s16 = sld [smem:[#allocation25_spill]]  ;;  %s1733_s5 = smov [#allocation7]  }
  0x5f   : > { %s1572_s11 = sshll.u32 %s1733_s5, 4  ;;  %s1573_s11 = int_to_ptr.vmem [resolvable:$false] %s1572_s11 }
  0x60   : > { %p1575_p0 = scmp.lt.s32.totalorder %s2002_s23, %s1573_s11 }
  0x61   : > { %672 = vmatpush1.bf16.msra.mxu0 %v1480_v50  ;;  %1343 = vmatpush3.bf16.msra.mxu1 %v1483_v52 }
  0x62   : > { %673 = vmatprep.subr.bf16.mxu0 %v1481_v51  ;;  %1344 = vmatprep.subr.bf16.mxu1 %v1487_v55  ;;  %s2016_s13 = scalar_lea.hbm %s2180_s12, %s1222_s27 }
  0x64   : > { %s2029_s17 = scalar_lea.hbm %s2182_s16, %s1222_s27 }
  0x65   : > { %674 = vmatpush1.bf16.msra.mxu0 %v1484_v53  ;;  %1345 = vmatpush3.bf16.msra.mxu1 %v1487_v55 }
  0x66   : > { %675 = vmatprep.subr.bf16.mxu0 %v1485_v54  ;;  %1346 = vmatprep.subr.bf16.mxu1 %v1491_v58 }
  0x69   : > { %676 = vmatpush1.bf16.msra.mxu0 %v1488_v56  ;;  %1347 = vmatpush3.bf16.msra.mxu1 %v1491_v58 }
  0x6a   : > { %677 = vmatprep.subr.bf16.mxu0 %v1489_v57  ;;  %1348 = vmatprep.subr.bf16.mxu1 %v1495_v61 }
  0x6d   : > { %678 = vmatpush1.bf16.msra.mxu0 %v1492_v59  ;;  %1349 = vmatpush3.bf16.msra.mxu1 %v1495_v61 }
  0x6e   : > { %679 = vmatprep.subr.bf16.mxu0 %v1493_v60 }
  0x71   : > { %680 = vmatpush1.bf16.msra.mxu0 %v1496_v63 }
  0xd9   : > { %v368_v10 = vpop.xlane.xlu0 %367  ;;  %v372_v11 = vpop.xlane.xlu1 %371 }
  0xda   : > { %v384_v12 = vmul.f32 0.0078125, %v368_v10  ;;  %v386_v13 = vmul.f32 0.0078125, %v372_v11 }
  0xdc   : > { %v1913_v14 = vsub.f32 %v357_v0, %v384_v12  ;;  %v1915_v15 = vsub.f32 %v359_v1, %v386_v13  ;;  %v1497_v0 = vld [vmem:[#allocation5 + $0x8] ss:$12 sps:$4 sm:$0xff]  }
  0xdd   : > { %v370_v16 = vpop.xlane.xlu0 %369  ;;  %v374_v17 = vpop.xlane.xlu1 %373  ;;  %1350 = vmatprep.subr.bf16.mxu1 %v1497_v0 }
  0xde   : > { %v385_v18 = vmul.f32 0.0078125, %v370_v16  ;;  %v400_v19 = vmul.f32 %v1913_v14, %v1913_v14  ;;  %v387_v20 = vmul.f32 0.0078125, %v374_v17  ;;  %v402_v23 = vmul.f32 %v1915_v15, %v1915_v15  ;;  %1351 = vmatpush3.bf16.msra.mxu1 %v1497_v0 }
  0xe0   : > { %v1919_v21 = vsub.f32 %v358_v2, %v385_v18  ;;  %408 = vadd.xlane.f32.xlu0 %v400_v19  ;;  %v1921_v22 = vsub.f32 %v360_v3, %v387_v20 }
  0xe1   : > { %v376_v24 = vpop.xlane.xlu0 %375  ;;  %v378_v25 = vpop.xlane.xlu1 %377 }
  0xe2   : > { %v388_v26 = vmul.f32 0.0078125, %v376_v24  ;;  %v401_v27 = vmul.f32 %v1919_v21, %v1919_v21  ;;  %v389_v28 = vmul.f32 0.0078125, %v378_v25  ;;  %v403_v31 = vmul.f32 %v1921_v22, %v1921_v22 }
  0xe4   : > { %v1927_v29 = vsub.f32 %v361_v4, %v388_v26  ;;  %412 = vadd.xlane.f32.xlu0 %v402_v23  ;;  %410 = vadd.xlane.f32.xlu1 %v401_v27  ;;  %v1929_v30 = vsub.f32 %v362_v5, %v389_v28 }
  0xe5   : > { %v380_v32 = vpop.xlane.xlu0 %379  ;;  %v382_v33 = vpop.xlane.xlu1 %381 }
  0xe6   : > { %v390_v34 = vmul.f32 0.0078125, %v380_v32  ;;  %v404_v35 = vmul.f32 %v1927_v29, %v1927_v29  ;;  %v391_v36 = vmul.f32 0.0078125, %v382_v33  ;;  %v405_v39 = vmul.f32 %v1929_v30, %v1929_v30  ;;  %v1167_v33 = vld [vmem:[%s2178_s1] ss:$0 sm:$0xff]  ;;  %s1568_s1 = scalar_lea.vmem %s2002_s23, 512 }
  0xe7   : > { %p1569_p1 = scmp.ne.s32.totalorder %s2002_s23, %s1568_s1 }
  0xe8   : > { %v1935_v37 = vsub.f32 %v363_v6, %v390_v34  ;;  %414 = vadd.xlane.f32.xlu1 %v403_v31  ;;  %416 = vadd.xlane.f32.xlu0 %v404_v35  ;;  %v1937_v38 = vsub.f32 %v364_v7, %v391_v36 }
  0xe9   : > { %p1570_p4 = pnand %p1569_p1, %p1864_p12 }
  0xea   : > { %v406_v40 = vmul.f32 %v1935_v37, %v1935_v37  ;;  %v407_v44 = vmul.f32 %v1937_v38, %v1937_v38 }
  0xeb   : > { %p1571_p8 = pneg %p1570_p4 }
  0xec   : > { %418 = vadd.xlane.f32.xlu1 %v405_v39  ;;  %420 = vadd.xlane.f32.xlu0 %v406_v40  ;;  %v1168_v40 = vld [vmem:[%s2142_s2] ss:$0 sm:$0xff] }
  0xf0   : > { %422 = vadd.xlane.f32.xlu1 %v407_v44 }
 0x169   : > { %v409_v1 = vpop.xlane.xlu0 %408 }
 0x16a   : > { %v424_v2 = vmul.f32 0.0078125, %v409_v1 }
 0x16c   : > { %v432_v3 = vadd.f32 1e-05, %v424_v2 }
 0x16d   : > { %v411_v4 = vpop.xlane.xlu1 %410  ;;  %v413_v5 = vpop.xlane.xlu0 %412 }
 0x16e   : > { %1498 = vrsqrt.f32 %v432_v3  ;;  %v425_v6 = vmul.f32 0.0078125, %v411_v4  ;;  %v426_v7 = vmul.f32 0.0078125, %v413_v5 }
 0x170   : > { %v433_v8 = vadd.f32 1e-05, %v425_v6  ;;  %v434_v9 = vadd.f32 1e-05, %v426_v7 }
 0x171   : > { %v415_v10 = vpop.xlane.xlu1 %414  ;;  %v417_v11 = vpop.xlane.xlu0 %416 }
 0x172   : > { %1500 = vrsqrt.f32 %v433_v8  ;;  %v427_v12 = vmul.f32 0.0078125, %v415_v10  ;;  %v428_v13 = vmul.f32 0.0078125, %v417_v11 }
 0x173   : > { %1502 = vrsqrt.f32 %v434_v9 }
 0x174   : > { %v435_v16 = vadd.f32 1e-05, %v427_v12  ;;  %v436_v17 = vadd.f32 1e-05, %v428_v13 }
 0x175   : > { %v419_v18 = vpop.xlane.xlu1 %418  ;;  %v421_v19 = vpop.xlane.xlu0 %420 }
 0x176   : > { %1504 = vrsqrt.f32 %v435_v16  ;;  %v429_v20 = vmul.f32 0.0078125, %v419_v18  ;;  %v430_v23 = vmul.f32 0.0078125, %v421_v19 }
 0x177   : > { %1506 = vrsqrt.f32 %v436_v17 }
 0x178   : > { %v437_v24 = vadd.f32 1e-05, %v429_v20  ;;  %v438_v25 = vadd.f32 1e-05, %v430_v23 }
 0x179   : > { %v423_v26 = vpop.xlane.xlu1 %422 }
 0x17a   : > { %1508 = vrsqrt.f32 %v437_v24  ;;  %v431_v27 = vmul.f32 0.0078125, %v423_v26 }
 0x17b   : > { %v1499_v28 = vpop.eup %1498  ;;  %1510 = vrsqrt.f32 %v438_v25 }
 0x17c   : > { %v439_v31 = vadd.f32 1e-05, %v431_v27  ;;  %v448_v32 = vmul.f32 %v1499_v28, %v1913_v14 }
 0x17e   : > { %1512 = vrsqrt.f32 %v439_v31  ;;  %v462_v39 = vmul.f32 %v1167_v33, %v448_v32 }
 0x17f   : > { %v1501_v34 = vpop.eup %1500 }
 0x180   : > { %v1503_v35 = vpop.eup %1502  ;;  %v449_v36 = vmul.f32 %v1501_v34, %v1919_v21  ;;  %v476_v45 = vadd.f32 %v1168_v40, %v462_v39 }
 0x181   : > { %v450_v41 = vmul.f32 %v1503_v35, %v1915_v15 }
 0x182   : > { %v463_v42 = vmul.f32 %v1167_v33, %v449_v36 }
 0x183   : > { %v1505_v43 = vpop.eup %1504  ;;  %v464_v44 = vmul.f32 %v1167_v33, %v450_v41 }
 0x184   : > { %v1507_v14 = vpop.eup %1506  ;;  %v477_v46 = vadd.f32 %v1168_v40, %v463_v42  ;;  %v451_v47 = vmul.f32 %v1505_v43, %v1921_v22 }
 0x185   : > { %v452_v48 = vmul.f32 %v1507_v14, %v1927_v29  ;;  %v478_v51 = vadd.f32 %v1168_v40, %v464_v44 }
 0x186   : > { %v484_v49 = vpack.c.bf16 %v477_v46, %v476_v45  ;;  %v465_v50 = vmul.f32 %v1167_v33, %v451_v47 }
 0x187   : > { %v1509_v21 = vpop.eup %1508  ;;  %v466_v54 = vmul.f32 %v1167_v33, %v452_v48 }
 0x188   : > { %v1511_v52 = vpop.eup %1510  ;;  %698 = vmatmul.mubr.bf16.vlgmr.msra.gmra.mxu0 %v484_v49  ;;  %1352 = vmatprep.mubr.bf16.mxu1 %v484_v49  ;;  %v479_v53 = vadd.f32 %v1168_v40, %v465_v50  ;;  %v453_v15 = vmul.f32 %v1509_v21, %v1929_v30 }
 0x189   : > { %707 = vmatprep.mubr.bf16.mxu0 %v1732_v62  ;;  %v454_v55 = vmul.f32 %v1511_v52, %v1935_v37  ;;  %v480_v29 = vadd.f32 %v1168_v40, %v466_v54  ;;  %v522_v37 = vlaneseq }
 0x18a   : > { %v485_v56 = vpack.c.bf16 %v479_v53, %v478_v51  ;;  %v467_v57 = vmul.f32 %v1167_v33, %v453_v15 }
 0x18b   : > { %v1513_v22 = vpop.eup %1512  ;;  %v468_v60 = vmul.f32 %v1167_v33, %v454_v55  ;;  %v523_v2 = vshrl.u32 %v522_v37, 7 }
 0x18c   : > { %1353 = vmatmul.mubr.bf16.vlgmr.msra.gmra.mxu1 %v485_v56  ;;  %v481_v58 = vadd.f32 %v1168_v40, %v467_v57  ;;  %v455_v59 = vmul.f32 %v1513_v22, %v1937_v38  ;;  %v520_v38 = vld [vmem:[%s2144_s4] sm:$0x7] }
 0x18d   : > { %v482_v0 = vadd.f32 %v1168_v40, %v468_v60  ;;  %v524_v3 = vsub.s32 0, %v523_v2  ;;  %v528_v4 = vsub.s32 1, %v523_v2  ;;  %v532_v7 = vsub.s32 2, %v523_v2 }
 0x18e   : > { %v486_v61 = vpack.c.bf16 %v481_v58, %v480_v29  ;;  %v469_v63 = vmul.f32 %v1167_v33, %v455_v59 }
 0x18f   : > { %v1966_v6 = vrot.slane %v520_v38, %v524_v3  ;;  %v1968_v9 = vrot.slane %v520_v38, %v528_v4  ;;  %v533_v13 = vrot.slane %v520_v38, %v532_v7 }
 0x190   : > { %708 = vmatmul.mubr.bf16.gmra.mxu0 %v485_v56  ;;  %1356 = vmatprep.mubr.bf16.mxu1 %v486_v61  ;;  %v483_v30 = vadd.f32 %v1168_v40, %v469_v63 }
 0x191   : > { %717 = vmatprep.mubr.bf16.mxu0 %v1732_v62 }
 0x192   : > { %v487_v1 = vpack.c.bf16 %v483_v30, %v482_v0 }
 0x194   : > { %1357 = vmatmul.mubr.bf16.gmra.mxu1 %v487_v1 }
 0x198   : > { %718 = vmatmul.mubr.bf16.gmra.mxu0 %v486_v61 }
 0x199   : > { %727 = vmatprep.mubr.bf16.mxu0 %v1732_v62 }
 0x1a0   : > { %728 = vmatmul.mubr.bf16.gmra.mxu0 %v487_v1 }
 0x248   : > { %v699_v5 = vpop.f32.mrf.mxu0 }
 0x249   : > { %v700_v62 = vadd.f32 %v699_v5, %v1966_v6 }
 0x24a   : > { %v701_v8 = vpop.f32.mrf.mxu0 }
 0x24b   : > { %v702_v18 = vadd.f32 %v701_v8, %v1968_v9 }
 0x24c   : > { %v703_v10 = vpop.f32.mrf.mxu0  ;;  %v1354_v11 = vpop.f32.mrf.mxu1 }
 0x24d   : > { %v704_v12 = vadd.f32 %v703_v10, %v1966_v6  ;;  %v781_v25 = vadd.f32 %v1354_v11, %v533_v13 }
 0x24e   : > { %v705_v16 = vpop.f32.mrf.mxu0  ;;  %v772_v17 = vpop.f32.mrf.mxu1 }
 0x24f   : > { %v1258_v19 = vpack.c.bf16 %v704_v12, %v700_v62  ;;  %v706_v20 = vadd.f32 %v705_v16, %v1968_v9  ;;  %v773_v32 = vadd.f32 %v772_v17, %v533_v13 }
 0x250   : > { %v709_v23 = vpop.f32.mrf.mxu0  ;;  %v1355_v24 = vpop.f32.mrf.mxu1 }
 0x251   : > { %1259 = vst [vmem:[%s1975_s19] sm:$0xff] %v1258_v19   ;;  %v1278_v26 = vpack.c.bf16 %v706_v20, %v702_v18  ;;  %v784_v27 = vadd.f32 %v1355_v24, %v533_v13  ;;  %v710_v39 = vadd.f32 %v709_v23, %v1966_v6 }
 0x252   : > { %v711_v28 = vpop.f32.mrf.mxu0  ;;  %v775_v31 = vpop.f32.mrf.mxu1 }
 0x253   : > { %1279 = vst [vmem:[%s1978_s10] sm:$0xff] %v1278_v26   ;;  %v1303_v33 = vpack.c.bf16 %v784_v27, %v781_v25  ;;  %v776_v34 = vadd.f32 %v775_v31, %v533_v13  ;;  %v712_v44 = vadd.f32 %v711_v28, %v1968_v9 }
 0x254   : > { %v713_v35 = vpop.f32.mrf.mxu0  ;;  %v1358_v36 = vpop.f32.mrf.mxu1 }
 0x255   : > { %1321 = vst [vmem:[%s1982_s3 + $0x8] sm:$0xff] %v1303_v33   ;;  %v1298_v40 = vpack.c.bf16 %v776_v34, %v773_v32  ;;  %v714_v41 = vadd.f32 %v713_v35, %v1966_v6  ;;  %v797_v48 = vadd.f32 %v1358_v36, %v533_v13 }
 0x256   : > { %v715_v42 = vpop.f32.mrf.mxu0  ;;  %v788_v43 = vpop.f32.mrf.mxu1 }
 0x257   : > { %1299 = vst [vmem:[%s1982_s3] sm:$0xff] %v1298_v40   ;;  %v1263_v14 = vpack.c.bf16 %v714_v41, %v710_v39  ;;  %v716_v45 = vadd.f32 %v715_v42, %v1968_v9  ;;  %v789_v52 = vadd.f32 %v788_v43, %v533_v13 }
 0x258   : > { %v719_v46 = vpop.f32.mrf.mxu0  ;;  %v1359_v47 = vpop.f32.mrf.mxu1 }
 0x259   : > { %1315 = vst [vmem:[%s1975_s19 + $0x8] sm:$0xff] %v1263_v14   ;;  %v1283_v49 = vpack.c.bf16 %v716_v45, %v712_v44  ;;  %v800_v50 = vadd.f32 %v1359_v47, %v533_v13  ;;  %v720_v55 = vadd.f32 %v719_v46, %v1966_v6 }
 0x25a   : > { %v721_v21 = vpop.f32.mrf.mxu0  ;;  %v791_v51 = vpop.f32.mrf.mxu1 }
 0x25b   : > { %1318 = vst [vmem:[%s1978_s10 + $0x8] sm:$0xff] %v1283_v49   ;;  %v1313_v53 = vpack.c.bf16 %v800_v50, %v797_v48  ;;  %v792_v15 = vadd.f32 %v791_v51, %v533_v13  ;;  %v722_v29 = vadd.f32 %v721_v21, %v1968_v9 }
 0x25c   : > { %v723_v54 = vpop.f32.mrf.mxu0 }
 0x25d   : > { %1323 = vst [vmem:[%s1982_s3 + $0x18] sm:$0xff] %v1313_v53   ;;  %v1308_v56 = vpack.c.bf16 %v792_v15, %v789_v52  ;;  %v724_v57 = vadd.f32 %v723_v54, %v1966_v6 }
 0x25e   : > { %v725_v22 = vpop.f32.mrf.mxu0 }
 0x25f   : > { %1322 = vst [vmem:[%s1982_s3 + $0x10] sm:$0xff] %v1308_v56   ;;  %v1268_v58 = vpack.c.bf16 %v724_v57, %v720_v55  ;;  %v726_v59 = vadd.f32 %v725_v22, %v1968_v9  ;;  %s2024_s3 = scalar_lea.hbm %s2181_s14, %s1222_s27 }
 0x260   : > { %v729_v60 = vpop.f32.mrf.mxu0 }
 0x261   : > { %1316 = vst [vmem:[%s1975_s19 + $0x10] sm:$0xff] %v1268_v58   ;;  %v1288_v61 = vpack.c.bf16 %v726_v59, %v722_v29  ;;  %v730_v30 = vadd.f32 %v729_v60, %v1966_v6 }
 0x262   : > { %v731_v63 = vpop.f32.mrf.mxu0 }
 0x263   : > { %1319 = vst [vmem:[%s1978_s10 + $0x10] sm:$0xff] %v1288_v61   ;;  %v732_v2 = vadd.f32 %v731_v63, %v1968_v9 }
 0x264   : > { %v733_v0 = vpop.f32.mrf.mxu0 }
 0x265   : > { %v734_v1 = vadd.f32 %v733_v0, %v1966_v6 }
 0x266   : > { %v735_v37 = vpop.f32.mrf.mxu0 }
 0x267   : > { %v1273_v3 = vpack.c.bf16 %v734_v1, %v730_v30  ;;  %v736_v38 = vadd.f32 %v735_v37, %v1968_v9 }
 0x269   : > { %1317 = vst [vmem:[%s1975_s19 + $0x18] sm:$0xff] %v1273_v3   ;;  %v1293_v4 = vpack.c.bf16 %v736_v38, %v732_v2  ;;  %s1574_s19 = scalar_lea.vmem %s1573_s11, 1024 }
 0x26a   : > { %p1576_p3 = scmp.lt.s32.totalorder %s1574_s19, %s1568_s1 }
 0x26c   : > { %p1577_p5 = por %p1576_p3, %p1575_p0 }
 0x26e   : > { %p1578_p2 = pnand %p1577_p5, %p1571_p8 }
 0x270   : > { %1581 = shalt.err (!%p1578_p2)
}
 0x271   : > { %s1582_s27 = scalar_lea.hbm %s2016_s13, 512  ;;  %s1586_s7 = scalar_lea.hbm %s2180_s12, 2048 }
 0x272   : > { %p1583_p6 = scmp.ne.s32.totalorder %s2016_s13, %s1582_s27  ;;  %p1587_p11 = scmp.lt.s32.totalorder %s2016_s13, %s2180_s12 }
 0x273   : > { %p1588_p10 = scmp.lt.s32.totalorder %s1586_s7, %s1582_s27 }
 0x274   : > { %p1584_p7 = pnand %p1583_p6, %p1864_p12 }
 0x275   : > { %p1589_p13 = por %p1588_p10, %p1587_p11 }
 0x276   : > { %p1585_p9 = pneg %p1584_p7 }
 0x278   : > { %p1590_p1 = pnand %p1589_p13, %p1585_p9 }
 0x27a   : > { %1593 = shalt.err (!%p1590_p1)
}
 0x27b   : > { %s1734_s1 = smov 64   ;;  %s1735_s11 = smov 4   ;;  %1320 = vst [vmem:[%s1978_s10 + $0x18] sm:$0xff] %v1293_v4  }
 0x27c   : > { %1366 = dma.vmem_to_hbm [thread:$0]  (%p1864_p12), %s2002_s23, 512, %s2016_s13, %s924_s0, %s1734_s1, %s1734_s1, %s1735_s11  }
 0x27d   : > { %s2183_s19 = sand.u32 1, %s1819_s9   ;;  %s1594_s18 = scalar_lea.vmem %s2005_s29, 512 }
 0x27e   : > { %s2060_s27 = scalar_lea.sflag [#allocation9], %s2183_s19  ;;  %p1595_p4 = scmp.ne.s32.totalorder %s2005_s29, %s1594_s18 }
 0x27f   : > { %s1736_s20 = smov [#allocation8]  }
 0x280   : > { %p1596_p8 = pnand %p1595_p4, %p1864_p12  ;;  %s1598_s7 = sshll.u32 %s1736_s20, 4  ;;  %s1599_s7 = int_to_ptr.vmem [resolvable:$false] %s1598_s7 }
 0x281   : > { %s1600_s21 = scalar_lea.vmem %s1599_s7, 1024  ;;  %p1601_p3 = scmp.lt.s32.totalorder %s2005_s29, %s1599_s7 }
 0x282   : > { %p1597_p0 = pneg %p1596_p8  ;;  %p1602_p5 = scmp.lt.s32.totalorder %s1600_s21, %s1594_s18 }
 0x284   : > { %p1603_p2 = por %p1602_p5, %p1601_p3 }
 0x286   : > { %p1604_p6 = pnand %p1603_p2, %p1597_p0 }
 0x288   : > { %1607 = shalt.err (!%p1604_p6)
}
 0x289   : > { %s1608_s0 = scalar_lea.hbm %s2024_s3, 512  ;;  %s1612_s10 = scalar_lea.hbm %s2181_s14, 2048 }
 0x28a   : > { %p1609_p7 = scmp.ne.s32.totalorder %s2024_s3, %s1608_s0  ;;  %p1613_p10 = scmp.lt.s32.totalorder %s2024_s3, %s2181_s14 }
 0x28b   : > { %p1614_p13 = scmp.lt.s32.totalorder %s1612_s10, %s1608_s0 }
 0x28c   : > { %p1610_p9 = pnand %p1609_p7, %p1864_p12 }
 0x28d   : > { %p1615_p1 = por %p1614_p13, %p1613_p10 }
 0x28e   : > { %p1611_p11 = pneg %p1610_p9 }
 0x290   : > { %p1616_p4 = pnand %p1615_p1, %p1611_p11 }
 0x292   : > { %1619 = shalt.err (!%p1616_p4)
}
 0x293   : > { %1367 = dma.vmem_to_hbm [thread:$0]  (%p1864_p12), %s2005_s29, 512, %s2024_s3, %s2060_s27, %s1734_s1, %s1734_s1, %s1735_s11  }
 0x294   : > { %s1620_s5 = scalar_lea.vmem %s2018_s28, 512  ;;  %s1737_s19 = smov [#allocation10]  }
 0x295   : > { %p1621_p8 = scmp.ne.s32.totalorder %s2018_s28, %s1620_s5  ;;  %s1624_s18 = sshll.u32 %s1737_s19, 4  ;;  %s1625_s18 = int_to_ptr.vmem [resolvable:$false] %s1624_s18 }
 0x296   : > { %s1626_s20 = scalar_lea.vmem %s1625_s18, 1024  ;;  %p1627_p5 = scmp.lt.s32.totalorder %s2018_s28, %s1625_s18 }
 0x297   : > { %p1622_p0 = pnand %p1621_p8, %p1864_p12  ;;  %p1628_p2 = scmp.lt.s32.totalorder %s1626_s20, %s1620_s5 }
 0x299   : > { %p1623_p3 = pneg %p1622_p0  ;;  %p1629_p6 = por %p1628_p2, %p1627_p5 }
 0x29b   : > { %p1630_p7 = pnand %p1629_p6, %p1623_p3 }
 0x29d   : > { %1633 = shalt.err (!%p1630_p7)
}
 0x29e   : > { %s1634_s7 = scalar_lea.hbm %s2029_s17, 512  ;;  %s1638_s21 = scalar_lea.hbm %s2182_s16, 2048 }
 0x29f   : > { %p1635_p9 = scmp.ne.s32.totalorder %s2029_s17, %s1634_s7  ;;  %p1639_p13 = scmp.lt.s32.totalorder %s2029_s17, %s2182_s16 }
 0x2a0   : > { %p1640_p1 = scmp.lt.s32.totalorder %s1638_s21, %s1634_s7 }
 0x2a1   : > { %p1636_p11 = pnand %p1635_p9, %p1864_p12 }
 0x2a2   : > { %p1641_p4 = por %p1640_p1, %p1639_p13 }
 0x2a3   : > { %p1637_p10 = pneg %p1636_p11 }
 0x2a5   : > { %p1642_p8 = pnand %p1641_p4, %p1637_p10 }
 0x2a7   : > { %1645 = shalt.err (!%p1642_p8)
}
 0x2a8   : > { %1368 = dma.vmem_to_hbm [thread:$0]  (%p1864_p12), %s2018_s28, 512, %s2029_s17, %s2060_s27, %s1734_s1, %s1734_s1, %s1735_s11  }
 0x2a9 PF: > { %s2184_s6 = sld [smem:[#allocation15_spill]]  ;;  %p1393_p0 = scmp.ge.s32.totalorder %s1724_s8, 2 }
 0x2aa   : > { %s2185_s10 = sld [smem:[#allocation17_spill]] }
 0x2af   : > { %s1000_s23 = sand.u32 1, %s2184_s6  }
 0x2b0   : > { %p2186_p3 = scmp.ne.s32.totalorder %s2185_s10, 0  ;;  %s1001_s13 = scalar_lea.sflag [#allocation4], %s1000_s23 }
 0x2b2   : > { %p1381_p5 = pnand %p1393_p0, %p2186_p3 }
 0x2b4   : > { %p1382_p2 = pneg %p1381_p5 }
 0x2b6   : > { %1687 = dma.done.wait (%p1382_p2), %s1001_s13, 512  }
 0x2b7   : > { %1689 = vsyncadd (%p1382_p2), %s1001_s13, 4294966784  ;;  %s2187_s15 = sadd.s32 4294967294, %s1724_s8  }
 0x2b8   : > { %s1009_s5 = sand.u32 1, %s2187_s15  }
 0x2b9   : > { %s1010_s19 = scalar_lea.sflag [#allocation9], %s1009_s5 }
 0x2ba   : > { %1691 = dma.done.wait (%p1382_p2), %s1010_s19, 1024  }
 0x2bb   : > { %1693 = vsyncadd (%p1382_p2), %s1010_s19, 4294966272  ;;  %s28_s8 = sadd.s32 1, %s1724_s8   ;;  %s2188_s28 = smov %s1881_s24 }
 0x2bc   : > { %p25_p12 = scmp.ge.s32.totalorder %s28_s8, 6   ;;  %s2189_s27 = sld [smem:[#allocation16_spill]] }
 0x2bd   : > { %s2190_s29 = sld [smem:[#allocation18_spill]]  ;;  %s2191_s24 = smov %s1700_s25 }
 0x2be   : > { %s2192_s25 = smov %s1704_s26  ;;  %s2193_s26 = smov %s2188_s28 }
 0x2bf   : > { %s2194_s28 = smov %s1720_s30  ;;  %s2195_s30 = smov %s2201_s22 }
 0x2c0   :  { %27 = sbr.rel (!%p25_p12) target bundleno = 17 (0x11), region = 121 }
 0x2c5   :  { %1024 = vsyncpa [#allocation3], 1 }
 0x2c6   :  { %1026 = vsyncpa [#allocation3 + $0x1], 1 }
 0x2c7   :  { %1027 = vsyncpa [#allocation6], 1 }
 0x2c8   :  { %1028 = vsyncpa [#allocation4], 1 }
 0x2c9   :  { %1030 = vsyncpa [#allocation4 + $0x1], 1 }
 0x2ca   :  { %1031 = vsyncpa [#allocation9], 1 }
 0x2cb   :  { %1033 = vsyncpa [#allocation9 + $0x1], 1 }

</bundles_post_ra>
